<compile_context>
chip_gen: v5e
topology: v5e:2x2
jax: 0.10.0
libtpu: 0.0.40
codegen_flags: <defaults>
</compile_context>

<pallas_src>
import functools

import jax
import jax.numpy as jnp
from jax.experimental import pallas as pl
from jax.experimental.pallas import tpu as pltpu

_LANE = 128
_TM_CAP = 4096                           # hard cap on the spatial tile (lanes)
_TILE_VMEM_BUDGET = 12 * 1024 * 1024     # budget for double-buffered tiles
_VMEM_LIMIT = 32 * 1024 * 1024           # scoped VMEM limit handed to Mosaic
_SMALL_HW_PACK_TARGET = 2048             # pack batches until ~this many lanes/step


def _round_up(a, b):
    return ((a + b - 1) // b) * b


# ---------------------------------------------------------------------------
# stride == 1 projection:  y[n] = W @ x[n] + bias   (x flattened to [Cin, H*W])
# ---------------------------------------------------------------------------
def _proj_kernel(x_ref, w_ref, b_ref, o_ref, *, nb):
    # x_ref: [nb, Cin, TM]  w_ref: [Cout, Cin]  b_ref: [Cout, 1]  o_ref: [nb, Cout, TM]
    w = w_ref[...]
    bias = b_ref[...]
    for b in range(nb):                      # static unroll; leading-dim indexing only
        y = jnp.dot(w, x_ref[b], preferred_element_type=jnp.float32)
        o_ref[b] = (y + bias).astype(o_ref.dtype)


def _project_stride1(x3d, w_folded, bias):
    n, cin, hw = x3d.shape
    cout = w_folded.shape[0]
    dsize = x3d.dtype.itemsize

    # Pack several batch images per grid step when the feature map is small.
    nb = 1
    if hw < _SMALL_HW_PACK_TARGET:
        nb = max(1, min(n, _SMALL_HW_PACK_TARGET // max(hw, 1)))

    # Balanced, lane-dense spatial tile bounded by a VMEM budget
    # (double-buffered input + output tiles).
    per_m_bytes = 2 * nb * (cin + cout) * dsize
    tm_cap = max(_LANE,
                 min(_TM_CAP, (_TILE_VMEM_BUDGET // per_m_bytes) // _LANE * _LANE))
    if hw <= tm_cap:
        tm = hw                                   # full extent: always legal
    else:
        ntiles = pl.cdiv(hw, tm_cap)
        tm = min(tm_cap, _round_up(pl.cdiv(hw, ntiles), _LANE))

    grid = (pl.cdiv(n, nb), pl.cdiv(hw, tm))

    cost = pl.CostEstimate(
        flops=2 * n * cout * cin * hw,
        transcendentals=0,
        bytes_accessed=(n * cin * hw + n * cout * hw + cout * cin) * dsize,
    )

    return pl.pallas_call(
        functools.partial(_proj_kernel, nb=nb),
        out_shape=jax.ShapeDtypeStruct((n, cout, hw), x3d.dtype),
        grid_spec=pltpu.PrefetchScalarGridSpec(
            num_scalar_prefetch=0,
            grid=grid,
            in_specs=[
                pl.BlockSpec((nb, cin, tm), lambda bi, i: (bi, 0, i)),
                pl.BlockSpec((cout, cin), lambda bi, i: (0, 0)),   # resident
                pl.BlockSpec((cout, 1), lambda bi, i: (0, 0)),     # resident
            ],
            out_specs=pl.BlockSpec((nb, cout, tm), lambda bi, i: (bi, 0, i)),
        ),
        compiler_params=pltpu.CompilerParams(
            dimension_semantics=("parallel", "parallel"),
            vmem_limit_bytes=_VMEM_LIMIT,
        ),
        cost_estimate=cost,
    )(x3d, w_folded, bias)


# ---------------------------------------------------------------------------
# stride > 1 projection, fused subsampling (requires H % stride == 0).
# x is viewed as [N, Cin, Ho, stride*W]; per output row the kernel keeps the
# first W lanes (H-phase 0) and picks every stride-th column with a 0/1
# selection matmul on the MXU, then applies the folded 1x1 conv + bias.
# ---------------------------------------------------------------------------
def _proj_stride_kernel(x_ref, w_ref, b_ref, sel_ref, o_ref, *, rows, w_in):
    # x_ref: [Cin, rows, stride*W]  sel_ref: [W, Wo]
    # w_ref: [Cout, Cin]  b_ref: [Cout, 1]  o_ref: [Cout, rows, Wo]
    w = w_ref[...]
    bias = b_ref[...]
    sel = sel_ref[...]
    for r in range(rows):                    # static unroll; 2-D dots only
        xr = x_ref[:, r, :]                  # [Cin, stride*W]
        xr = xr[:, :w_in]                    # phase-0 input row (contiguous lanes)
        xs = jnp.dot(xr, sel)                # [Cin, Wo]; exact 0/1 selection (MXU)
        y = jnp.dot(w, xs, preferred_element_type=jnp.float32)   # [Cout, Wo]
        o_ref[:, r, :] = (y + bias).astype(o_ref.dtype)


def _project_strided(x_nchw, w_folded, bias, stride):
    n, cin, h, w = x_nchw.shape
    cout = w_folded.shape[0]
    ho = h // stride                          # caller guarantees h % stride == 0
    wo = (w - 1) // stride + 1
    dsize = x_nchw.dtype.itemsize

    # Free (contiguous) view: each output row owns its `stride` input rows.
    x4 = x_nchw.reshape(n, cin, ho, stride * w)

    # 0/1 matrix picking every stride-th column of the phase-0 input row.
    sel = (jnp.arange(w)[:, None] == (jnp.arange(wo) * stride)[None, :]).astype(
        x_nchw.dtype)

    # Output rows per grid step: multiple of 8 (or the full extent), bounded by
    # the VMEM budget for the double-buffered input + output row tiles.
    rows = ho if ho <= 16 else 16
    if ho > 16:
        row_bytes = 2 * (cin * stride * w + cout * wo) * dsize
        while rows > 8 and rows * row_bytes > _TILE_VMEM_BUDGET:
            rows -= 8

    grid = (n, pl.cdiv(ho, rows))

    cost = pl.CostEstimate(
        flops=2 * n * ho * (cin * w * wo + cout * cin * wo),
        transcendentals=0,
        bytes_accessed=(n * cin * h * w + n * cout * ho * wo
                        + cout * cin + w * wo) * dsize,
    )

    return pl.pallas_call(
        functools.partial(_proj_stride_kernel, rows=rows, w_in=w),
        out_shape=jax.ShapeDtypeStruct((n, cout, ho, wo), x_nchw.dtype),
        grid_spec=pltpu.PrefetchScalarGridSpec(
            num_scalar_prefetch=0,
            grid=grid,
            in_specs=[
                pl.BlockSpec((None, cin, rows, stride * w),
                             lambda b, r: (b, 0, r, 0)),
                pl.BlockSpec((cout, cin), lambda b, r: (0, 0)),    # resident
                pl.BlockSpec((cout, 1), lambda b, r: (0, 0)),      # resident
                pl.BlockSpec((w, wo), lambda b, r: (0, 0)),        # resident
            ],
            out_specs=pl.BlockSpec((None, cout, rows, wo),
                                   lambda b, r: (b, 0, r, 0)),
        ),
        compiler_params=pltpu.CompilerParams(
            dimension_semantics=("parallel", "parallel"),
            vmem_limit_bytes=_VMEM_LIMIT,
        ),
        cost_estimate=cost,
    )(x4, w_folded, bias, sel)


# ---------------------------------------------------------------------------
# Public forward (matches PyTorch Shortcut.forward, inference mode).
# ---------------------------------------------------------------------------
@functools.partial(jax.jit, static_argnames=("stride",))
def shortcut_forward(x_nchw, conv_w, gamma, beta, running_mean, running_var,
                     stride=1, eps=1e-5):
    """x_nchw: [N, Cin, H, W]; conv_w: [Cout, Cin] (or [Cout, Cin, 1, 1])."""
    n, cin, h, w = x_nchw.shape
    if conv_w.ndim == 4:
        conv_w = conv_w.reshape(conv_w.shape[0], conv_w.shape[1])
    cout = conv_w.shape[0]

    # Identity path (self.conv is None).
    if cin == cout and stride == 1:
        return x_nchw

    # Fold BatchNorm (inference) into the conv weight + per-channel bias, in f32.
    inv_std = jax.lax.rsqrt(running_var.astype(jnp.float32) + eps)
    scale = gamma.astype(jnp.float32) * inv_std                      # [Cout]
    bias = (beta.astype(jnp.float32)
            - running_mean.astype(jnp.float32) * scale).reshape(cout, 1)
    w_folded = (conv_w.astype(jnp.float32) * scale[:, None]).astype(x_nchw.dtype)

    if stride == 1:
        out3 = _project_stride1(x_nchw.reshape(n, cin, h * w), w_folded, bias)
        return out3.reshape(n, cout, h, w)

    if h % stride == 0:
        return _project_strided(x_nchw, w_folded, bias, stride)

    # TODO(synk): rare non-divisible H: fall back to an XLA pre-slice (extra
    # HBM pass) followed by the stride-1 projection kernel.
    xs = x_nchw[:, :, ::stride, ::stride]
    ho, wo = xs.shape[2], xs.shape[3]
    out3 = _project_stride1(xs.reshape(n, cin, ho * wo), w_folded, bias)
    return out3.reshape(n, cout, ho, wo)


# ---------------------------------------------------------------------------
# Pure-JAX reference and tests.
# ---------------------------------------------------------------------------
def _reference(x_nchw, conv_w, gamma, beta, running_mean, running_var,
               stride, eps=1e-5):
    xs = x_nchw[:, :, ::stride, ::stride]
    y = jnp.einsum("nchw,oc->nohw", xs, conv_w)
    inv_std = jax.lax.rsqrt(running_var + eps)
    scale = (gamma * inv_std)[None, :, None, None]
    bias = (beta - running_mean * gamma * inv_std)[None, :, None, None]
    return y * scale + bias


if __name__ == "__main__":
    key = jax.random.PRNGKey(0)
    k_x, k_w, k_g, k_b, k_m, k_v = jax.random.split(key, 6)

    N, CIN, COUT, H, W, STRIDE = 2, 4, 8, 16, 16, 2

    x = jax.random.normal(k_x, (N, CIN, H, W), dtype=jnp.float32)
    conv_w = jax.random.normal(k_w, (COUT, CIN), dtype=jnp.float32) * 0.1
    gamma = jax.random.uniform(k_g, (COUT,), dtype=jnp.float32, minval=0.5, maxval=1.5)
    beta = jax.random.normal(k_b, (COUT,), dtype=jnp.float32) * 0.1
    running_mean = jax.random.normal(k_m, (COUT,), dtype=jnp.float32) * 0.1
    running_var = jax.random.uniform(k_v, (COUT,), dtype=jnp.float32,
                                     minval=0.5, maxval=1.5)

    # Downsample projection (stride 2, fused subsampling path).
    out = shortcut_forward(x, conv_w, gamma, beta, running_mean, running_var,
                           stride=STRIDE)
    out = jax.block_until_ready(out)
    ref = _reference(x, conv_w, gamma, beta, running_mean, running_var, STRIDE)
    assert out.shape == (N, COUT, H // STRIDE, W // STRIDE), out.shape
    assert jnp.allclose(out, ref, atol=1e-4, rtol=1e-4)

    # Channel-change projection with stride == 1 (no subsampling).
    out_s1 = shortcut_forward(x, conv_w, gamma, beta, running_mean, running_var,
                              stride=1)
    out_s1 = jax.block_until_ready(out_s1)
    ref_s1 = _reference(x, conv_w, gamma, beta, running_mean, running_var, 1)
    assert jnp.allclose(out_s1, ref_s1, atol=1e-4, rtol=1e-4)

    # Larger stride-2 case exercising row tiling + a partial last row block.
    x_big = jax.random.normal(k_x, (N, CIN, 48, 32), dtype=jnp.float32)
    out_big = shortcut_forward(x_big, conv_w, gamma, beta, running_mean,
                               running_var, stride=2)
    out_big = jax.block_until_ready(out_big)
    ref_big = _reference(x_big, conv_w, gamma, beta, running_mean, running_var, 2)
    assert out_big.shape == (N, COUT, 24, 16), out_big.shape
    assert jnp.allclose(out_big, ref_big, atol=1e-4, rtol=1e-4)

    # Identity path (in_channels == out_channels, stride == 1).
    x_id = jax.random.normal(k_x, (N, CIN, H, W), dtype=jnp.float32)
    out_id = shortcut_forward(x_id, jnp.eye(CIN, dtype=jnp.float32),
                              jnp.ones((CIN,)), jnp.zeros((CIN,)),
                              jnp.zeros((CIN,)), jnp.ones((CIN,)), stride=1)
    out_id = jax.block_until_ready(out_id)
    assert jnp.array_equal(out_id, x_id)

    print("KERNEL_OK")
</pallas_src>

<mosaic_0001>
module attributes {stable_mosaic.version = 11 : i64} {
  func.func @_proj_stride_kernel(%arg0: i32, %arg1: i32, %arg2: memref<1x4x8x32xf32, #tpu.memory_space<vmem>>, %arg3: memref<8x4xf32, #tpu.memory_space<vmem>>, %arg4: memref<8x1xf32, #tpu.memory_space<vmem>>, %arg5: memref<16x8xf32, #tpu.memory_space<vmem>>, %arg6: memref<1x8x8x8xf32, #tpu.memory_space<vmem>>) attributes {dimension_semantics = [#tpu.dimension_semantics<parallel>, #tpu.dimension_semantics<parallel>], iteration_bounds = array<i64: 2, 1>, scalar_prefetch = 0 : i64, scratch_operands = 0 : i64, tpu.core_type = #tpu.core_type<tc>, window_params = [{transform_indices = @transform_0, window_bounds = array<i64: 1, 4, 8, 32>}, {pipeline_mode = #tpu.pipeline_mode<synchronous>, transform_indices = @transform_1, window_bounds = array<i64: 8, 4>}, {pipeline_mode = #tpu.pipeline_mode<synchronous>, transform_indices = @transform_2, window_bounds = array<i64: 8, 1>}, {pipeline_mode = #tpu.pipeline_mode<synchronous>, transform_indices = @transform_3, window_bounds = array<i64: 16, 8>}, {transform_indices = @transform_4, window_bounds = array<i64: 1, 8, 8, 8>}]} {
    %c0 = arith.constant 0 : index
    %c0_0 = arith.constant 0 : index
    %0 = vector.load %arg3[%c0, %c0_0] : memref<8x4xf32, #tpu.memory_space<vmem>>, vector<8x4xf32>
    %c0_1 = arith.constant 0 : index
    %c0_2 = arith.constant 0 : index
    %1 = vector.load %arg4[%c0_1, %c0_2] : memref<8x1xf32, #tpu.memory_space<vmem>>, vector<8x1xf32>
    %c0_3 = arith.constant 0 : index
    %c0_4 = arith.constant 0 : index
    %2 = vector.load %arg5[%c0_3, %c0_4] : memref<16x8xf32, #tpu.memory_space<vmem>>, vector<16x8xf32>
    %c0_5 = arith.constant 0 : index
    %c0_6 = arith.constant 0 : index
    %c0_7 = arith.constant 0 : index
    %c0_8 = arith.constant 0 : index
    %3 = vector.load %arg2[%c0_5, %c0_6, %c0_7, %c0_8] : memref<1x4x8x32xf32, #tpu.memory_space<vmem>>, vector<1x4x1x32xf32>
    %4 = vector.shape_cast %3 : vector<1x4x1x32xf32> to vector<4x32xf32>
    %5 = vector.extract_strided_slice %4 {offsets = [0, 0], sizes = [4, 16], strides = [1, 1]} : vector<4x32xf32> to vector<4x16xf32>
    %cst = arith.constant dense<0.000000e+00> : vector<4x8xf32>
    %6 = tpu.matmul %5, %2, %cst {dimension_numbers = #tpu.dot_dimension_numbers<[1], [0], [0], [1], [0, 0, 1, 1], [], []>} : vector<4x16xf32>, vector<16x8xf32>, vector<4x8xf32> -> vector<4x8xf32>
    %cst_9 = arith.constant dense<0.000000e+00> : vector<8x8xf32>
    %7 = tpu.matmul %0, %6, %cst_9 {dimension_numbers = #tpu.dot_dimension_numbers<[1], [0], [0], [1], [0, 0, 1, 1], [], []>} : vector<8x4xf32>, vector<4x8xf32>, vector<8x8xf32> -> vector<8x8xf32>
    %8 = vector.broadcast %1 : vector<8x1xf32> to vector<8x8xf32>
    %9 = arith.addf %7, %8 : vector<8x8xf32>
    %c0_10 = arith.constant 0 : index
    %c0_11 = arith.constant 0 : index
    %c0_12 = arith.constant 0 : index
    %c0_13 = arith.constant 0 : index
    %10 = vector.load %arg6[%c0_10, %c0_11, %c0_12, %c0_13] : memref<1x8x8x8xf32, #tpu.memory_space<vmem>>, vector<1x8x1x8xf32>
    %11 = vector.shape_cast %10 : vector<1x8x1x8xf32> to vector<8x8xf32>
    %12 = vector.shape_cast %9 : vector<8x8xf32> to vector<1x8x1x8xf32>
    tpu.vector_store %arg6[%c0_10, %c0_11, %c0_12, %c0_13], %12 {strides = array<i32>} : memref<1x8x8x8xf32, #tpu.memory_space<vmem>>, vector<1x8x1x8xf32>,
    %c0_14 = arith.constant 0 : index
    %c0_15 = arith.constant 0 : index
    %c1 = arith.constant 1 : index
    %c0_16 = arith.constant 0 : index
    %13 = vector.load %arg2[%c0_14, %c0_15, %c1, %c0_16] : memref<1x4x8x32xf32, #tpu.memory_space<vmem>>, vector<1x4x1x32xf32>
    %14 = vector.shape_cast %13 : vector<1x4x1x32xf32> to vector<4x32xf32>
    %15 = vector.extract_strided_slice %14 {offsets = [0, 0], sizes = [4, 16], strides = [1, 1]} : vector<4x32xf32> to vector<4x16xf32>
    %cst_17 = arith.constant dense<0.000000e+00> : vector<4x8xf32>
    %16 = tpu.matmul %15, %2, %cst_17 {dimension_numbers = #tpu.dot_dimension_numbers<[1], [0], [0], [1], [0, 0, 1, 1], [], []>} : vector<4x16xf32>, vector<16x8xf32>, vector<4x8xf32> -> vector<4x8xf32>
    %cst_18 = arith.constant dense<0.000000e+00> : vector<8x8xf32>
    %17 = tpu.matmul %0, %16, %cst_18 {dimension_numbers = #tpu.dot_dimension_numbers<[1], [0], [0], [1], [0, 0, 1, 1], [], []>} : vector<8x4xf32>, vector<4x8xf32>, vector<8x8xf32> -> vector<8x8xf32>
    %18 = vector.broadcast %1 : vector<8x1xf32> to vector<8x8xf32>
    %19 = arith.addf %17, %18 : vector<8x8xf32>
    %c0_19 = arith.constant 0 : index
    %c0_20 = arith.constant 0 : index
    %c1_21 = arith.constant 1 : index
    %c0_22 = arith.constant 0 : index
    %20 = vector.load %arg6[%c0_19, %c0_20, %c1_21, %c0_22] : memref<1x8x8x8xf32, #tpu.memory_space<vmem>>, vector<1x8x1x8xf32>
    %21 = vector.shape_cast %20 : vector<1x8x1x8xf32> to vector<8x8xf32>
    %22 = vector.shape_cast %19 : vector<8x8xf32> to vector<1x8x1x8xf32>
    tpu.vector_store %arg6[%c0_19, %c0_20, %c1_21, %c0_22], %22 {strides = array<i32>} : memref<1x8x8x8xf32, #tpu.memory_space<vmem>>, vector<1x8x1x8xf32>,
    %c0_23 = arith.constant 0 : index
    %c0_24 = arith.constant 0 : index
    %c2 = arith.constant 2 : index
    %c0_25 = arith.constant 0 : index
    %23 = vector.load %arg2[%c0_23, %c0_24, %c2, %c0_25] : memref<1x4x8x32xf32, #tpu.memory_space<vmem>>, vector<1x4x1x32xf32>
    %24 = vector.shape_cast %23 : vector<1x4x1x32xf32> to vector<4x32xf32>
    %25 = vector.extract_strided_slice %24 {offsets = [0, 0], sizes = [4, 16], strides = [1, 1]} : vector<4x32xf32> to vector<4x16xf32>
    %cst_26 = arith.constant dense<0.000000e+00> : vector<4x8xf32>
    %26 = tpu.matmul %25, %2, %cst_26 {dimension_numbers = #tpu.dot_dimension_numbers<[1], [0], [0], [1], [0, 0, 1, 1], [], []>} : vector<4x16xf32>, vector<16x8xf32>, vector<4x8xf32> -> vector<4x8xf32>
    %cst_27 = arith.constant dense<0.000000e+00> : vector<8x8xf32>
    %27 = tpu.matmul %0, %26, %cst_27 {dimension_numbers = #tpu.dot_dimension_numbers<[1], [0], [0], [1], [0, 0, 1, 1], [], []>} : vector<8x4xf32>, vector<4x8xf32>, vector<8x8xf32> -> vector<8x8xf32>
    %28 = vector.broadcast %1 : vector<8x1xf32> to vector<8x8xf32>
    %29 = arith.addf %27, %28 : vector<8x8xf32>
    %c0_28 = arith.constant 0 : index
    %c0_29 = arith.constant 0 : index
    %c2_30 = arith.constant 2 : index
    %c0_31 = arith.constant 0 : index
    %30 = vector.load %arg6[%c0_28, %c0_29, %c2_30, %c0_31] : memref<1x8x8x8xf32, #tpu.memory_space<vmem>>, vector<1x8x1x8xf32>
    %31 = vector.shape_cast %30 : vector<1x8x1x8xf32> to vector<8x8xf32>
    %32 = vector.shape_cast %29 : vector<8x8xf32> to vector<1x8x1x8xf32>
    tpu.vector_store %arg6[%c0_28, %c0_29, %c2_30, %c0_31], %32 {strides = array<i32>} : memref<1x8x8x8xf32, #tpu.memory_space<vmem>>, vector<1x8x1x8xf32>,
    %c0_32 = arith.constant 0 : index
    %c0_33 = arith.constant 0 : index
    %c3 = arith.constant 3 : index
    %c0_34 = arith.constant 0 : index
    %33 = vector.load %arg2[%c0_32, %c0_33, %c3, %c0_34] : memref<1x4x8x32xf32, #tpu.memory_space<vmem>>, vector<1x4x1x32xf32>
    %34 = vector.shape_cast %33 : vector<1x4x1x32xf32> to vector<4x32xf32>
    %35 = vector.extract_strided_slice %34 {offsets = [0, 0], sizes = [4, 16], strides = [1, 1]} : vector<4x32xf32> to vector<4x16xf32>
    %cst_35 = arith.constant dense<0.000000e+00> : vector<4x8xf32>
    %36 = tpu.matmul %35, %2, %cst_35 {dimension_numbers = #tpu.dot_dimension_numbers<[1], [0], [0], [1], [0, 0, 1, 1], [], []>} : vector<4x16xf32>, vector<16x8xf32>, vector<4x8xf32> -> vector<4x8xf32>
    %cst_36 = arith.constant dense<0.000000e+00> : vector<8x8xf32>
    %37 = tpu.matmul %0, %36, %cst_36 {dimension_numbers = #tpu.dot_dimension_numbers<[1], [0], [0], [1], [0, 0, 1, 1], [], []>} : vector<8x4xf32>, vector<4x8xf32>, vector<8x8xf32> -> vector<8x8xf32>
    %38 = vector.broadcast %1 : vector<8x1xf32> to vector<8x8xf32>
    %39 = arith.addf %37, %38 : vector<8x8xf32>
    %c0_37 = arith.constant 0 : index
    %c0_38 = arith.constant 0 : index
    %c3_39 = arith.constant 3 : index
    %c0_40 = arith.constant 0 : index
    %40 = vector.load %arg6[%c0_37, %c0_38, %c3_39, %c0_40] : memref<1x8x8x8xf32, #tpu.memory_space<vmem>>, vector<1x8x1x8xf32>
    %41 = vector.shape_cast %40 : vector<1x8x1x8xf32> to vector<8x8xf32>
    %42 = vector.shape_cast %39 : vector<8x8xf32> to vector<1x8x1x8xf32>
    tpu.vector_store %arg6[%c0_37, %c0_38, %c3_39, %c0_40], %42 {strides = array<i32>} : memref<1x8x8x8xf32, #tpu.memory_space<vmem>>, vector<1x8x1x8xf32>,
    %c0_41 = arith.constant 0 : index
    %c0_42 = arith.constant 0 : index
    %c4 = arith.constant 4 : index
    %c0_43 = arith.constant 0 : index
    %43 = vector.load %arg2[%c0_41, %c0_42, %c4, %c0_43] : memref<1x4x8x32xf32, #tpu.memory_space<vmem>>, vector<1x4x1x32xf32>
    %44 = vector.shape_cast %43 : vector<1x4x1x32xf32> to vector<4x32xf32>
    %45 = vector.extract_strided_slice %44 {offsets = [0, 0], sizes = [4, 16], strides = [1, 1]} : vector<4x32xf32> to vector<4x16xf32>
    %cst_44 = arith.constant dense<0.000000e+00> : vector<4x8xf32>
    %46 = tpu.matmul %45, %2, %cst_44 {dimension_numbers = #tpu.dot_dimension_numbers<[1], [0], [0], [1], [0, 0, 1, 1], [], []>} : vector<4x16xf32>, vector<16x8xf32>, vector<4x8xf32> -> vector<4x8xf32>
    %cst_45 = arith.constant dense<0.000000e+00> : vector<8x8xf32>
    %47 = tpu.matmul %0, %46, %cst_45 {dimension_numbers = #tpu.dot_dimension_numbers<[1], [0], [0], [1], [0, 0, 1, 1], [], []>} : vector<8x4xf32>, vector<4x8xf32>, vector<8x8xf32> -> vector<8x8xf32>
    %48 = vector.broadcast %1 : vector<8x1xf32> to vector<8x8xf32>
    %49 = arith.addf %47, %48 : vector<8x8xf32>
    %c0_46 = arith.constant 0 : index
    %c0_47 = arith.constant 0 : index
    %c4_48 = arith.constant 4 : index
    %c0_49 = arith.constant 0 : index
    %50 = vector.load %arg6[%c0_46, %c0_47, %c4_48, %c0_49] : memref<1x8x8x8xf32, #tpu.memory_space<vmem>>, vector<1x8x1x8xf32>
    %51 = vector.shape_cast %50 : vector<1x8x1x8xf32> to vector<8x8xf32>
    %52 = vector.shape_cast %49 : vector<8x8xf32> to vector<1x8x1x8xf32>
    tpu.vector_store %arg6[%c0_46, %c0_47, %c4_48, %c0_49], %52 {strides = array<i32>} : memref<1x8x8x8xf32, #tpu.memory_space<vmem>>, vector<1x8x1x8xf32>,
    %c0_50 = arith.constant 0 : index
    %c0_51 = arith.constant 0 : index
    %c5 = arith.constant 5 : index
    %c0_52 = arith.constant 0 : index
    %53 = vector.load %arg2[%c0_50, %c0_51, %c5, %c0_52] : memref<1x4x8x32xf32, #tpu.memory_space<vmem>>, vector<1x4x1x32xf32>
    %54 = vector.shape_cast %53 : vector<1x4x1x32xf32> to vector<4x32xf32>
    %55 = vector.extract_strided_slice %54 {offsets = [0, 0], sizes = [4, 16], strides = [1, 1]} : vector<4x32xf32> to vector<4x16xf32>
    %cst_53 = arith.constant dense<0.000000e+00> : vector<4x8xf32>
    %56 = tpu.matmul %55, %2, %cst_53 {dimension_numbers = #tpu.dot_dimension_numbers<[1], [0], [0], [1], [0, 0, 1, 1], [], []>} : vector<4x16xf32>, vector<16x8xf32>, vector<4x8xf32> -> vector<4x8xf32>
    %cst_54 = arith.constant dense<0.000000e+00> : vector<8x8xf32>
    %57 = tpu.matmul %0, %56, %cst_54 {dimension_numbers = #tpu.dot_dimension_numbers<[1], [0], [0], [1], [0, 0, 1, 1], [], []>} : vector<8x4xf32>, vector<4x8xf32>, vector<8x8xf32> -> vector<8x8xf32>
    %58 = vector.broadcast %1 : vector<8x1xf32> to vector<8x8xf32>
    %59 = arith.addf %57, %58 : vector<8x8xf32>
    %c0_55 = arith.constant 0 : index
    %c0_56 = arith.constant 0 : index
    %c5_57 = arith.constant 5 : index
    %c0_58 = arith.constant 0 : index
    %60 = vector.load %arg6[%c0_55, %c0_56, %c5_57, %c0_58] : memref<1x8x8x8xf32, #tpu.memory_space<vmem>>, vector<1x8x1x8xf32>
    %61 = vector.shape_cast %60 : vector<1x8x1x8xf32> to vector<8x8xf32>
    %62 = vector.shape_cast %59 : vector<8x8xf32> to vector<1x8x1x8xf32>
    tpu.vector_store %arg6[%c0_55, %c0_56, %c5_57, %c0_58], %62 {strides = array<i32>} : memref<1x8x8x8xf32, #tpu.memory_space<vmem>>, vector<1x8x1x8xf32>,
    %c0_59 = arith.constant 0 : index
    %c0_60 = arith.constant 0 : index
    %c6 = arith.constant 6 : index
    %c0_61 = arith.constant 0 : index
    %63 = vector.load %arg2[%c0_59, %c0_60, %c6, %c0_61] : memref<1x4x8x32xf32, #tpu.memory_space<vmem>>, vector<1x4x1x32xf32>
    %64 = vector.shape_cast %63 : vector<1x4x1x32xf32> to vector<4x32xf32>
    %65 = vector.extract_strided_slice %64 {offsets = [0, 0], sizes = [4, 16], strides = [1, 1]} : vector<4x32xf32> to vector<4x16xf32>
    %cst_62 = arith.constant dense<0.000000e+00> : vector<4x8xf32>
    %66 = tpu.matmul %65, %2, %cst_62 {dimension_numbers = #tpu.dot_dimension_numbers<[1], [0], [0], [1], [0, 0, 1, 1], [], []>} : vector<4x16xf32>, vector<16x8xf32>, vector<4x8xf32> -> vector<4x8xf32>
    %cst_63 = arith.constant dense<0.000000e+00> : vector<8x8xf32>
    %67 = tpu.matmul %0, %66, %cst_63 {dimension_numbers = #tpu.dot_dimension_numbers<[1], [0], [0], [1], [0, 0, 1, 1], [], []>} : vector<8x4xf32>, vector<4x8xf32>, vector<8x8xf32> -> vector<8x8xf32>
    %68 = vector.broadcast %1 : vector<8x1xf32> to vector<8x8xf32>
    %69 = arith.addf %67, %68 : vector<8x8xf32>
    %c0_64 = arith.constant 0 : index
    %c0_65 = arith.constant 0 : index
    %c6_66 = arith.constant 6 : index
    %c0_67 = arith.constant 0 : index
    %70 = vector.load %arg6[%c0_64, %c0_65, %c6_66, %c0_67] : memref<1x8x8x8xf32, #tpu.memory_space<vmem>>, vector<1x8x1x8xf32>
    %71 = vector.shape_cast %70 : vector<1x8x1x8xf32> to vector<8x8xf32>
    %72 = vector.shape_cast %69 : vector<8x8xf32> to vector<1x8x1x8xf32>
    tpu.vector_store %arg6[%c0_64, %c0_65, %c6_66, %c0_67], %72 {strides = array<i32>} : memref<1x8x8x8xf32, #tpu.memory_space<vmem>>, vector<1x8x1x8xf32>,
    %c0_68 = arith.constant 0 : index
    %c0_69 = arith.constant 0 : index
    %c7 = arith.constant 7 : index
    %c0_70 = arith.constant 0 : index
    %73 = vector.load %arg2[%c0_68, %c0_69, %c7, %c0_70] : memref<1x4x8x32xf32, #tpu.memory_space<vmem>>, vector<1x4x1x32xf32>
    %74 = vector.shape_cast %73 : vector<1x4x1x32xf32> to vector<4x32xf32>
    %75 = vector.extract_strided_slice %74 {offsets = [0, 0], sizes = [4, 16], strides = [1, 1]} : vector<4x32xf32> to vector<4x16xf32>
    %cst_71 = arith.constant dense<0.000000e+00> : vector<4x8xf32>
    %76 = tpu.matmul %75, %2, %cst_71 {dimension_numbers = #tpu.dot_dimension_numbers<[1], [0], [0], [1], [0, 0, 1, 1], [], []>} : vector<4x16xf32>, vector<16x8xf32>, vector<4x8xf32> -> vector<4x8xf32>
    %cst_72 = arith.constant dense<0.000000e+00> : vector<8x8xf32>
    %77 = tpu.matmul %0, %76, %cst_72 {dimension_numbers = #tpu.dot_dimension_numbers<[1], [0], [0], [1], [0, 0, 1, 1], [], []>} : vector<8x4xf32>, vector<4x8xf32>, vector<8x8xf32> -> vector<8x8xf32>
    %78 = vector.broadcast %1 : vector<8x1xf32> to vector<8x8xf32>
    %79 = arith.addf %77, %78 : vector<8x8xf32>
    %c0_73 = arith.constant 0 : index
    %c0_74 = arith.constant 0 : index
    %c7_75 = arith.constant 7 : index
    %c0_76 = arith.constant 0 : index
    %80 = vector.load %arg6[%c0_73, %c0_74, %c7_75, %c0_76] : memref<1x8x8x8xf32, #tpu.memory_space<vmem>>, vector<1x8x1x8xf32>
    %81 = vector.shape_cast %80 : vector<1x8x1x8xf32> to vector<8x8xf32>
    %82 = vector.shape_cast %79 : vector<8x8xf32> to vector<1x8x1x8xf32>
    tpu.vector_store %arg6[%c0_73, %c0_74, %c7_75, %c0_76], %82 {strides = array<i32>} : memref<1x8x8x8xf32, #tpu.memory_space<vmem>>, vector<1x8x1x8xf32>,
    return
  }
  func.func @transform_0(%arg0: i32, %arg1: i32) -> (i32, i32, i32, i32) {
    %c0_i32 = arith.constant 0 : i32
    %c0_i32_0 = arith.constant 0 : i32
    %c0_i32_1 = arith.constant 0 : i32
    return %arg0, %c0_i32, %arg1, %c0_i32_0 : i32, i32, i32, i32
  }
  func.func @transform_1(%arg0: i32, %arg1: i32) -> (i32, i32) {
    %c0_i32 = arith.constant 0 : i32
    %c0_i32_0 = arith.constant 0 : i32
    %c0_i32_1 = arith.constant 0 : i32
    return %c0_i32, %c0_i32_0 : i32, i32
  }
  func.func @transform_2(%arg0: i32, %arg1: i32) -> (i32, i32) {
    %c0_i32 = arith.constant 0 : i32
    %c0_i32_0 = arith.constant 0 : i32
    %c0_i32_1 = arith.constant 0 : i32
    return %c0_i32, %c0_i32_0 : i32, i32
  }
  func.func @transform_3(%arg0: i32, %arg1: i32) -> (i32, i32) {
    %c0_i32 = arith.constant 0 : i32
    %c0_i32_0 = arith.constant 0 : i32
    %c0_i32_1 = arith.constant 0 : i32
    return %c0_i32, %c0_i32_0 : i32, i32
  }
  func.func @transform_4(%arg0: i32, %arg1: i32) -> (i32, i32, i32, i32) {
    %c0_i32 = arith.constant 0 : i32
    %c0_i32_0 = arith.constant 0 : i32
    %c0_i32_1 = arith.constant 0 : i32
    return %arg0, %c0_i32, %arg1, %c0_i32_0 : i32, i32, i32, i32
  }
}

</mosaic_0001>

<bundles_post_ra>
// kernel: shortcut_forward.1
= control target key start
LH: loop header
LB: loop body
LE: loop exit
PB: predicated region body
PF: predicated region fallthrough
CT: control target
= control target key end

     0   :  { %9 = vsyncpa [#allocation3], 0  ;;  %s1563_s0 = inlined_call_operand.vmem [shape: f32[2,4,8,32], index: 0, kind: input, shape index: {}]   ;;  %s1564_s1 = inlined_call_operand.vmem [shape: f32[8,4], index: 1, kind: input, shape index: {}]   ;;  %s1565_s2 = inlined_call_operand.vmem [shape: f32[8,1], index: 2, kind: input, shape index: {}]   ;;  %s1566_s3 = inlined_call_operand.vmem [shape: f32[16,8], index: 3, kind: input, shape index: {}]   ;;  %s1567_s4 = inlined_call_operand.hbm [shape: f32[2,8,8,8], index: 4, kind: output, shape index: {}]  }
   0x1   :  { %11 = vsyncpa [#allocation3 + $0x1], 0  ;;  %s1197_s15 = smov 0   ;;  %s1199_s16 = smov 0  }
   0x2   :  { %s1201_s17 = smov 0   ;;  %s1203_s18 = smov 0  }
   0x3   :  { %s1205_s19 = smov 0   ;;  %s1207_s20 = smov 0  }
   0x4 LB: > { %s991_s21 = sadd.s32 4294967295, %s1167_s20   ;;  %s992_s22 = sadd.s32 4294967294, %s1167_s20   ;;  %s1167_s20 = sphi %s1207_s20, %s17_s20   ;;  %s1163_s19 = sphi %s1205_s19, %s1574_s19   ;;  %s1159_s18 = sphi %s1203_s18, %s1573_s18   ;;  %s1155_s17 = sphi %s1201_s17, %s1572_s17   ;;  %s1151_s16 = sphi %s1199_s16, %s1571_s16   ;;  %s1147_s15 = sphi %s1197_s15, %s1570_s15  }
   0x5   : > { %s29_s23 = sadd.s32 1, %s1163_s19  ;;  %s129_s24 = sadd.s32 1, %s1155_s17 }
   0x6   : > { %p31_p0 = scmp.ge.s32.totalorder %s29_s23, 2  ;;  %p139_p1 = scmp.ne.s32.totalorder %s1155_s17, %s1151_s16 }
   0x7   : > { %p140_p2 = scmp.eq.s32.totalorder %s991_s21, 1  ;;  %p145_p3 = scmp.ne.s32.totalorder %s1151_s16, %s1147_s15 }
   0x8   : > { %s1576_s23 = smov (%p31_p0, %s29_s23), 0  ;;  %p146_p5 = scmp.eq.s32.totalorder %s992_s22, 1 }
   0x9   : > { %p1237_p4 = por %p140_p2, %p139_p1  ;;  %s124_s26 = ssub.s32 %s1163_s19, %s1576_s23 }
   0xa   : > { %p995_p6 = scmp.ge.s32.totalorder %s1167_s20, 1  ;;  %p127_p7 = scmp.eq.s32.totalorder %s124_s26, 0 }
   0xb   : > { %p1244_p8 = por %p146_p5, %p145_p3  ;;  %p184_p9 = scmp.lt.s32.totalorder %s1167_s20, 3 }
   0xc   : > { %s1250_s28 = scalar_select %p127_p7, %s1155_s17, %s129_s24  }
   0xd   : > { %p185_p10 = pnand %p995_p6, %p184_p9 }
   0xe   : > { %p213_p11 = scmp.lt.s32.totalorder (!%p185_p10), %s1159_s18, 1  ;;  %s210_s22 = sand.u32 (!%p185_p10), 1, %s1151_s16  }
   0xf   : > { %188 = sbr.rel (%p185_p10) target bundleno = 454 (0x1c6), region = 36  ;;  %s996_s24 = sshll.u32 (!%p185_p10), %s210_s22, 6 }
  0x10   : > { %s1378_s26 = scalar_lea.vmem (!%p185_p10), [#allocation2], %s996_s24  ;;  %s1029_s29 = sshll.u32 (!%p185_p10), %s1159_s18, 6 }
  0x11   : > { %s909_s6 = scalar_lea.hbm (!%p185_p10), %s1567_s4, %s1029_s29  ;;  %s1109_s13 = scalar_lea.hbm (!%p185_p10), %s1567_s4, 128 }
  0x14   : > { %v1255_v0 = vld [vmem:[%s1566_s3 + $0x8] sm:$0xff]  ;;  %v1260_v1 = vld [vmem:[%s1566_s3] sm:$0xff]  ;;  %s214_s7 = scalar_select %p213_p11, %s1159_s18, 1  ;;  %vm234_vm0 = vcmask 1041409   ;;  %vm237_vm1 = vcmask 1042434   ;;  %vm240_vm2 = vcmask 1043459  }
  0x15   : > { %259 = vmatpush.msra.mxu0 %v1255_v0  ;;  %352 = vmatpush.msra.mxu2 %v1255_v0  ;;  %vm242_vm3 = vcmask 130048   ;;  %v222_v31 = vld [vmem:[%s1565_s2] sm:$0xff]  ;;  %v1169_v33 = vmov 0   ;;  %vm274_vm4 = vcmask 1043456   ;;  %vm270_vm5 = vcmask 31744   ;;  %s910_s18 = sshll.u32 %s1378_s26, 4  ;;  %s911_s18 = int_to_ptr.vmem [resolvable:$true] %s910_s18 }
  0x16   : > { %s1028_s8 = sshll.u32 %s214_s7, 5  ;;  %1088 = vset.pattern.permute.xlu0 %v1169_v33  ;;  %v1328_v58 = vld [vmem:[%s1564_s1] sm:$0xff]  ;;  %vm313_vm6 = vcmask 57344   ;;  %s912_s7 = sshll.u32 %s909_s6, 4  ;;  %s913_s7 = int_to_ptr.hbm [resolvable:$true] %s912_s7 }
  0x17   : > { %260 = vmatpush.msra.mxu0 %v1260_v1  ;;  %353 = vmatpush.msra.mxu2 %v1260_v1  ;;  %s1272_s11 = scalar_lea.vmem %s1563_s0, %s1028_s8  ;;  %s897_s8 = scalar_lea.sflag [#allocation3], %s210_s22 }
  0x18   : > { %v225_v2 = vld [vmem:[%s1272_s11] sm:$0x1]  ;;  %v226_v3 = vld [vmem:[%s1272_s11 + $0x8] sm:$0x1]  ;;  %v227_v4 = vld [vmem:[%s1272_s11 + $0x10] sm:$0x1]  ;;  %267 = vperm.xlu0 %1088, %v222_v31  }
  0x19   : > { %516 = vmatpush.msrb.mxu0 %v1255_v0  ;;  %v228_v5 = vld [vmem:[%s1272_s11 + $0x18] sm:$0x1]  ;;  %v233_v6 = vrot.slane %v226_v3, 7  ;;  %v236_v7 = vrot.slane %v227_v4, 6  ;;  %v323_v12 = vld [vmem:[%s1272_s11 + $0x9] sm:$0x1] }
  0x1a   : > { %v239_v8 = vrot.slane %v228_v5, 5  ;;  %v324_v13 = vld [vmem:[%s1272_s11 + $0x11] sm:$0x1]  ;;  %v330_v14 = vrot.slane %v323_v12, 7  ;;  %v322_v15 = vld [vmem:[%s1272_s11 + $0x1] sm:$0x1] }
  0x1b   : > { %517 = vmatpush.msrb.mxu0 %v1260_v1  ;;  %v235_v9 = vsel %vm234_vm0, %v233_v6, %v225_v2  ;;  %v325_v16 = vld [vmem:[%s1272_s11 + $0x19] sm:$0x1]  ;;  %v332_v17 = vrot.slane %v324_v13, 6  ;;  %v487_v22 = vld [vmem:[%s1272_s11 + $0xb] sm:$0x1]  ;;  %s1103_s9 = sshra.s32 %s913_s7, 4  ;;  %s1104_s9 = int_to_ptr.hbm [resolvable:$true] %s1103_s9 }
  0x1c   : > { %v238_v10 = vsel %vm237_vm1, %v236_v7, %v235_v9  ;;  %v331_v18 = vsel %vm234_vm0, %v330_v14, %v322_v15  ;;  %v334_v19 = vrot.slane %v325_v16, 5  ;;  %v486_v23 = vld [vmem:[%s1272_s11 + $0x3] sm:$0x1]  ;;  %v494_v24 = vrot.slane %v487_v22, 7  ;;  %v488_v25 = vld [vmem:[%s1272_s11 + $0x13] sm:$0x1]  ;;  %p1110_p1 = scmp.lt.s32.totalorder %s1104_s9, %s1567_s4 }
  0x1d   : > { %v241_v11 = vsel %vm240_vm2, %v239_v8, %v238_v10  ;;  %v333_v20 = vsel %vm237_vm1, %v332_v17, %v331_v18  ;;  %v489_v26 = vld [vmem:[%s1272_s11 + $0x1b] sm:$0x1]  ;;  %v496_v28 = vrot.slane %v488_v25, 6  ;;  %v651_v34 = vld [vmem:[%s1272_s11 + $0xd] sm:$0x1]  ;;  %s1105_s10 = scalar_lea.hbm %s1104_s9, 64 }
  0x1e   : > { %999 = vmatmul.msk.f32.vlgmr.msra.gmra.mxu0 %vm242_vm3, %v241_v11  ;;  %v335_v21 = vsel %vm240_vm2, %v334_v19, %v333_v20  ;;  %v495_v27 = vsel %vm234_vm0, %v494_v24, %v486_v23  ;;  %v498_v29 = vrot.slane %v489_v26, 5  ;;  %v652_v35 = vld [vmem:[%s1272_s11 + $0x15] sm:$0x1]  ;;  %v658_v36 = vrot.slane %v651_v34, 7  ;;  %v650_v37 = vld [vmem:[%s1272_s11 + $0x5] sm:$0x1]  ;;  %p1106_p12 = scmp.ne.s32.totalorder %s1104_s9, %s1105_s10  ;;  %p1111_p2 = scmp.lt.s32.totalorder %s1109_s13, %s1105_s10 }
  0x1f   : > { %680 = vmatpush.msra.mxu0 %v1255_v0  ;;  %1002 = vmatmul.msk.f32.vlgmr.msra.gmra.mxu2 %vm242_vm3, %v335_v21  ;;  %v497_v30 = vsel %vm237_vm1, %v496_v28, %v495_v27  ;;  %v653_v38 = vld [vmem:[%s1272_s11 + $0x1d] sm:$0x1]  ;;  %v660_v39 = vrot.slane %v652_v35, 6  ;;  %v815_v44 = vld [vmem:[%s1272_s11 + $0xf] sm:$0x1] }
  0x20   : > { %v499_v32 = vsel %vm240_vm2, %v498_v29, %v497_v30  ;;  %v659_v40 = vsel %vm234_vm0, %v658_v36, %v650_v37  ;;  %v662_v41 = vrot.slane %v653_v38, 5  ;;  %v816_v45 = vld [vmem:[%s1272_s11 + $0x17] sm:$0x1]  ;;  %v822_v46 = vrot.slane %v815_v44, 7  ;;  %v814_v47 = vld [vmem:[%s1272_s11 + $0x7] sm:$0x1]  ;;  %p1107_p13 = pnand %p1106_p12, %p1237_p4  ;;  %p1112_p3 = por %p1111_p2, %p1110_p1 }
  0x21   : > { %681 = vmatpush.msra.mxu0 %v1260_v1  ;;  %v661_v42 = vsel %vm237_vm1, %v660_v39, %v659_v40  ;;  %v817_v48 = vld [vmem:[%s1272_s11 + $0x1f] sm:$0x1]  ;;  %v824_v49 = vrot.slane %v816_v45, 6  ;;  %v405_v54 = vld [vmem:[%s1272_s11 + $0xa] sm:$0x1] }
  0x22   : > { %v663_v43 = vsel %vm240_vm2, %v662_v41, %v661_v42  ;;  %v823_v50 = vsel %vm234_vm0, %v822_v46, %v814_v47  ;;  %v826_v51 = vrot.slane %v817_v48, 5  ;;  %v406_v55 = vld [vmem:[%s1272_s11 + $0x12] sm:$0x1]  ;;  %v412_v56 = vrot.slane %v405_v54, 7  ;;  %v404_v57 = vld [vmem:[%s1272_s11 + $0x2] sm:$0x1]  ;;  %p1108_p0 = pneg %p1107_p13 }
  0x23   : > { %v825_v52 = vsel %vm237_vm1, %v824_v49, %v823_v50  ;;  %v407_v60 = vld [vmem:[%s1272_s11 + $0x1a] sm:$0x1]  ;;  %v414_v61 = vrot.slane %v406_v55, 6  ;;  %v569_v63 = vld [vmem:[%s1272_s11 + $0xc] sm:$0x1] }
  0x24   : > { %v827_v53 = vsel %vm240_vm2, %v826_v51, %v825_v52  ;;  %v413_v62 = vsel %vm234_vm0, %v412_v56, %v404_v57  ;;  %v416_v2 = vrot.slane %v407_v60, 5  ;;  %v570_v4 = vld [vmem:[%s1272_s11 + $0x14] sm:$0x1]  ;;  %v576_v5 = vrot.slane %v569_v63, 7  ;;  %v568_v6 = vld [vmem:[%s1272_s11 + $0x4] sm:$0x1]  ;;  %p1113_p5 = pnand %p1112_p3, %p1108_p0 }
  0x25   : > { %v415_v3 = vsel %vm237_vm1, %v414_v61, %v413_v62  ;;  %v571_v8 = vld [vmem:[%s1272_s11 + $0x1c] sm:$0x1]  ;;  %v578_v9 = vrot.slane %v570_v4, 6  ;;  %v733_v11 = vld [vmem:[%s1272_s11 + $0xe] sm:$0x1] }
  0x26   : > { %1008 = vmatmul.msk.f32.vlgmr.msrb.gmra.mxu0 %vm242_vm3, %v499_v32  ;;  %v417_v7 = vsel %vm240_vm2, %v416_v2, %v415_v3  ;;  %v577_v10 = vsel %vm234_vm0, %v576_v5, %v568_v6  ;;  %v580_v12 = vrot.slane %v571_v8, 5  ;;  %v734_v14 = vld [vmem:[%s1272_s11 + $0x16] sm:$0x1]  ;;  %v740_v15 = vrot.slane %v733_v11, 7  ;;  %v732_v16 = vld [vmem:[%s1272_s11 + $0x6] sm:$0x1] }
  0x27   : > { %844 = vmatpush.msrb.mxu0 %v1255_v0  ;;  %v579_v13 = vsel %vm237_vm1, %v578_v9, %v577_v10  ;;  %v735_v18 = vld [vmem:[%s1272_s11 + $0x1e] sm:$0x1]  ;;  %v742_v19 = vrot.slane %v734_v14, 6 }
  0x28   : > { %v581_v17 = vsel %vm240_vm2, %v580_v12, %v579_v13  ;;  %v741_v20 = vsel %vm234_vm0, %v740_v15, %v732_v16  ;;  %v744_v21 = vrot.slane %v735_v18, 5 }
  0x29   : > { %845 = vmatpush.msrb.mxu0 %v1260_v1 }
  0x2e   : > { %1014 = vmatmul.msk.f32.vlgmr.msra.gmra.mxu0 %vm242_vm3, %v663_v43 }
  0x36   : > { %1020 = vmatmul.msk.f32.vlgmr.msrb.gmra.mxu0 %vm242_vm3, %v827_v53 }
  0x8a   : > { %v1375_v26 = vpop.permute.xlu0 %267 }
  0x9b   : > { %v262_v59 = vpop.f32.mrf.mxu0 }
  0x9c   : > { %1000 = vmatpush.msk.msra.mxu1 %vm274_vm4, %v262_v59 }
  0x9d   : > { %1001 = vmatmul.msk.f32.vlgmr.msra.gmra.mxu1 %vm270_vm5, %v1328_v58 }
  0x9e   : > { %434 = vmatpush.msrb.mxu1 %v1255_v0 }
  0xa0   : > { %435 = vmatpush.msrb.mxu1 %v1260_v1 }
  0xa2   : > { %598 = vmatpush.msra.mxu1 %v1255_v0 }
  0xa3   : > { %v519_v23 = vpop.f32.mrf.mxu0 }
  0xa4   : > { %599 = vmatpush.msra.mxu1 %v1260_v1  ;;  %1009 = vmatpush.msk.msrb.mxu2 %vm274_vm4, %v519_v23 }
  0xa5   : > { %1005 = vmatmul.msk.f32.vlgmr.msrb.gmra.mxu1 %vm242_vm3, %v417_v7  ;;  %1010 = vmatmul.msk.f32.vlgmr.msrb.gmra.mxu2 %vm270_vm5, %v1328_v58 }
  0xa6   : > { %762 = vmatpush.msrb.mxu1 %v1255_v0  ;;  %v743_v0 = vsel %vm237_vm1, %v742_v19, %v741_v20 }
  0xa7   : > { %v745_v22 = vsel %vm240_vm2, %v744_v21, %v743_v0 }
  0xa8   : > { %763 = vmatpush.msrb.mxu1 %v1260_v1  ;;  %v355_v1 = vpop.f32.mrf.mxu2 }
  0xa9   : > { %1003 = vmatpush.msk.msra.mxu3 %vm274_vm4, %v355_v1 }
  0xaa   : > { %1004 = vmatmul.msk.f32.vlgmr.msra.gmra.mxu3 %vm270_vm5, %v1328_v58 }
  0xab   : > { %v683_v24 = vpop.f32.mrf.mxu0 }
  0xac   : > { %1015 = vmatpush.msk.msra.mxu2 %vm274_vm4, %v683_v24 }
  0xad   : > { %1011 = vmatmul.msk.f32.vlgmr.msra.gmra.mxu1 %vm242_vm3, %v581_v17  ;;  %1016 = vmatmul.msk.f32.vlgmr.msra.gmra.mxu2 %vm270_vm5, %v1328_v58 }
  0xb3   : > { %v847_v25 = vpop.f32.mrf.mxu0 }
  0xb4   : > { %1021 = vmatpush.msk.msrb.mxu2 %vm274_vm4, %v847_v25 }
  0xb5   : > { %1017 = vmatmul.msk.f32.vlgmr.msrb.gmra.mxu1 %vm242_vm3, %v745_v22  ;;  %1022 = vmatmul.msk.f32.vlgmr.msrb.gmra.mxu2 %vm270_vm5, %v1328_v58 }
 0x11a   : > { %v295_v27 = vpop.f32.mrf.mxu1 }
 0x11b   : > { %v296_v28 = vadd.f32 %v295_v27, %v1375_v26 }
 0x11d   : > { %v299_v29 = vrot.slane %v296_v28, 1  ;;  %v300_v30 = vrot.slane %v296_v28, 2  ;;  %v301_v31 = vrot.slane %v296_v28, 3  ;;  %314 = vst.msk [vmem:[%s1378_s26] sm:$0x1] %vm313_vm6, %v296_v28  ;;  %v302_v32 = vrot.slane %v296_v28, 4 }
 0x11e   : > { %v303_v33 = vrot.slane %v296_v28, 5  ;;  %v304_v34 = vrot.slane %v296_v28, 6  ;;  %v305_v35 = vrot.slane %v296_v28, 7 }
 0x11f   : > { %315 = vst.msk [vmem:[%s1378_s26 + $0x8] sm:$0x1] %vm313_vm6, %v299_v29 }
 0x120   : > { %316 = vst.msk [vmem:[%s1378_s26 + $0x10] sm:$0x1] %vm313_vm6, %v300_v30 }
 0x121   : > { %317 = vst.msk [vmem:[%s1378_s26 + $0x18] sm:$0x1] %vm313_vm6, %v301_v31 }
 0x122   : > { %318 = vst.msk [vmem:[%s1378_s26 + $0x20] sm:$0x1] %vm313_vm6, %v302_v32  ;;  %v437_v36 = vpop.f32.mrf.mxu1 }
 0x123   : > { %319 = vst.msk [vmem:[%s1378_s26 + $0x28] sm:$0x1] %vm313_vm6, %v303_v33  ;;  %1006 = vmatpush.msk.msrb.mxu3 %vm274_vm4, %v437_v36 }
 0x124   : > { %320 = vst.msk [vmem:[%s1378_s26 + $0x30] sm:$0x1] %vm313_vm6, %v304_v34  ;;  %1007 = vmatmul.msk.f32.vlgmr.msrb.gmra.mxu3 %vm270_vm5, %v1328_v58 }
 0x125   : > { %321 = vst.msk [vmem:[%s1378_s26 + $0x38] sm:$0x1] %vm313_vm6, %v305_v35 }
 0x128   : > { %v542_v48 = vpop.f32.mrf.mxu2 }
 0x129   : > { %v543_v49 = vadd.f32 %v542_v48, %v1375_v26 }
 0x12a   : > { %v601_v37 = vpop.f32.mrf.mxu1 }
 0x12b   : > { %1012 = vmatpush.msk.msra.mxu3 %vm274_vm4, %v601_v37  ;;  %v546_v50 = vrot.slane %v543_v49, 1  ;;  %v547_v51 = vrot.slane %v543_v49, 2  ;;  %v548_v52 = vrot.slane %v543_v49, 3  ;;  %v549_v53 = vrot.slane %v543_v49, 4  ;;  %560 = vst.msk [vmem:[%s1378_s26 + $0x3] sm:$0x1] %vm313_vm6, %v543_v49 }
 0x12c   : > { %1013 = vmatmul.msk.f32.vlgmr.msra.gmra.mxu3 %vm270_vm5, %v1328_v58  ;;  %v550_v54 = vrot.slane %v543_v49, 5  ;;  %v551_v55 = vrot.slane %v543_v49, 6  ;;  %v552_v56 = vrot.slane %v543_v49, 7 }
 0x12d   : > { %v378_v39 = vpop.f32.mrf.mxu3  ;;  %561 = vst.msk [vmem:[%s1378_s26 + $0xb] sm:$0x1] %vm313_vm6, %v546_v50 }
 0x12e   : > { %v379_v40 = vadd.f32 %v378_v39, %v1375_v26  ;;  %562 = vst.msk [vmem:[%s1378_s26 + $0x13] sm:$0x1] %vm313_vm6, %v547_v51 }
 0x12f   : > { %563 = vst.msk [vmem:[%s1378_s26 + $0x1b] sm:$0x1] %vm313_vm6, %v548_v52 }
 0x130   : > { %v382_v41 = vrot.slane %v379_v40, 1  ;;  %v383_v42 = vrot.slane %v379_v40, 2  ;;  %v384_v43 = vrot.slane %v379_v40, 3  ;;  %396 = vst.msk [vmem:[%s1378_s26 + $0x1] sm:$0x1] %vm313_vm6, %v379_v40  ;;  %v385_v44 = vrot.slane %v379_v40, 4  ;;  %v706_v57 = vpop.f32.mrf.mxu2 }
 0x131   : > { %v386_v45 = vrot.slane %v379_v40, 5  ;;  %v387_v46 = vrot.slane %v379_v40, 6  ;;  %v388_v47 = vrot.slane %v379_v40, 7  ;;  %564 = vst.msk [vmem:[%s1378_s26 + $0x23] sm:$0x1] %vm313_vm6, %v549_v53 }
 0x132   : > { %v765_v38 = vpop.f32.mrf.mxu1  ;;  %397 = vst.msk [vmem:[%s1378_s26 + $0x9] sm:$0x1] %vm313_vm6, %v382_v41 }
 0x133   : > { %1018 = vmatpush.msk.msrb.mxu3 %vm274_vm4, %v765_v38  ;;  %398 = vst.msk [vmem:[%s1378_s26 + $0x11] sm:$0x1] %vm313_vm6, %v383_v42 }
 0x134   : > { %1019 = vmatmul.msk.f32.vlgmr.msrb.gmra.mxu3 %vm270_vm5, %v1328_v58  ;;  %399 = vst.msk [vmem:[%s1378_s26 + $0x19] sm:$0x1] %vm313_vm6, %v384_v43  ;;  %v707_v58 = vadd.f32 %v706_v57, %v1375_v26 }
 0x135   : > { %400 = vst.msk [vmem:[%s1378_s26 + $0x21] sm:$0x1] %vm313_vm6, %v385_v44 }
 0x136   : > { %401 = vst.msk [vmem:[%s1378_s26 + $0x29] sm:$0x1] %vm313_vm6, %v386_v45  ;;  %v710_v59 = vrot.slane %v707_v58, 1  ;;  %v711_v60 = vrot.slane %v707_v58, 2  ;;  %v712_v61 = vrot.slane %v707_v58, 3  ;;  %v713_v62 = vrot.slane %v707_v58, 4 }
 0x137   : > { %402 = vst.msk [vmem:[%s1378_s26 + $0x31] sm:$0x1] %vm313_vm6, %v387_v46  ;;  %v714_v63 = vrot.slane %v707_v58, 5  ;;  %v715_v2 = vrot.slane %v707_v58, 6  ;;  %v716_v3 = vrot.slane %v707_v58, 7 }
 0x138   : > { %403 = vst.msk [vmem:[%s1378_s26 + $0x39] sm:$0x1] %vm313_vm6, %v388_v47  ;;  %v870_v4 = vpop.f32.mrf.mxu2 }
 0x139   : > { %565 = vst.msk [vmem:[%s1378_s26 + $0x2b] sm:$0x1] %vm313_vm6, %v550_v54  ;;  %v871_v5 = vadd.f32 %v870_v4, %v1375_v26 }
 0x13a   : > { %566 = vst.msk [vmem:[%s1378_s26 + $0x33] sm:$0x1] %vm313_vm6, %v551_v55 }
 0x13b   : > { %567 = vst.msk [vmem:[%s1378_s26 + $0x3b] sm:$0x1] %vm313_vm6, %v552_v56  ;;  %v874_v6 = vrot.slane %v871_v5, 1  ;;  %v875_v7 = vrot.slane %v871_v5, 2  ;;  %v876_v8 = vrot.slane %v871_v5, 3  ;;  %v877_v9 = vrot.slane %v871_v5, 4 }
 0x13c   : > { %724 = vst.msk [vmem:[%s1378_s26 + $0x5] sm:$0x1] %vm313_vm6, %v707_v58  ;;  %v878_v10 = vrot.slane %v871_v5, 5  ;;  %v879_v11 = vrot.slane %v871_v5, 6  ;;  %v880_v12 = vrot.slane %v871_v5, 7 }
 0x13d   : > { %725 = vst.msk [vmem:[%s1378_s26 + $0xd] sm:$0x1] %vm313_vm6, %v710_v59 }
 0x13e   : > { %726 = vst.msk [vmem:[%s1378_s26 + $0x15] sm:$0x1] %vm313_vm6, %v711_v60 }
 0x13f   : > { %727 = vst.msk [vmem:[%s1378_s26 + $0x1d] sm:$0x1] %vm313_vm6, %v712_v61 }
 0x140   : > { %728 = vst.msk [vmem:[%s1378_s26 + $0x25] sm:$0x1] %vm313_vm6, %v713_v62 }
 0x141   : > { %729 = vst.msk [vmem:[%s1378_s26 + $0x2d] sm:$0x1] %vm313_vm6, %v714_v63 }
 0x142   : > { %730 = vst.msk [vmem:[%s1378_s26 + $0x35] sm:$0x1] %vm313_vm6, %v715_v2 }
 0x143   : > { %731 = vst.msk [vmem:[%s1378_s26 + $0x3d] sm:$0x1] %vm313_vm6, %v716_v3 }
 0x144   : > { %888 = vst.msk [vmem:[%s1378_s26 + $0x7] sm:$0x1] %vm313_vm6, %v871_v5 }
 0x145   : > { %889 = vst.msk [vmem:[%s1378_s26 + $0xf] sm:$0x1] %vm313_vm6, %v874_v6 }
 0x146   : > { %890 = vst.msk [vmem:[%s1378_s26 + $0x17] sm:$0x1] %vm313_vm6, %v875_v7 }
 0x147   : > { %891 = vst.msk [vmem:[%s1378_s26 + $0x1f] sm:$0x1] %vm313_vm6, %v876_v8 }
 0x148   : > { %892 = vst.msk [vmem:[%s1378_s26 + $0x27] sm:$0x1] %vm313_vm6, %v877_v9 }
 0x149   : > { %893 = vst.msk [vmem:[%s1378_s26 + $0x2f] sm:$0x1] %vm313_vm6, %v878_v10 }
 0x14a   : > { %894 = vst.msk [vmem:[%s1378_s26 + $0x37] sm:$0x1] %vm313_vm6, %v879_v11 }
 0x14b   : > { %895 = vst.msk [vmem:[%s1378_s26 + $0x3f] sm:$0x1] %vm313_vm6, %v880_v12 }
 0x1a7   : > { %v460_v13 = vpop.f32.mrf.mxu3 }
 0x1a8   : > { %v461_v14 = vadd.f32 %v460_v13, %v1375_v26 }
 0x1aa   : > { %v464_v15 = vrot.slane %v461_v14, 1  ;;  %v465_v16 = vrot.slane %v461_v14, 2  ;;  %v466_v17 = vrot.slane %v461_v14, 3  ;;  %478 = vst.msk [vmem:[%s1378_s26 + $0x2] sm:$0x1] %vm313_vm6, %v461_v14  ;;  %v467_v18 = vrot.slane %v461_v14, 4 }
 0x1ab   : > { %v468_v19 = vrot.slane %v461_v14, 5  ;;  %v469_v20 = vrot.slane %v461_v14, 6  ;;  %v470_v21 = vrot.slane %v461_v14, 7 }
 0x1ac   : > { %479 = vst.msk [vmem:[%s1378_s26 + $0xa] sm:$0x1] %vm313_vm6, %v464_v15 }
 0x1ad   : > { %480 = vst.msk [vmem:[%s1378_s26 + $0x12] sm:$0x1] %vm313_vm6, %v465_v16 }
 0x1ae   : > { %481 = vst.msk [vmem:[%s1378_s26 + $0x1a] sm:$0x1] %vm313_vm6, %v466_v17 }
 0x1af   : > { %482 = vst.msk [vmem:[%s1378_s26 + $0x22] sm:$0x1] %vm313_vm6, %v467_v18  ;;  %v624_v0 = vpop.f32.mrf.mxu3 }
 0x1b0   : > { %483 = vst.msk [vmem:[%s1378_s26 + $0x2a] sm:$0x1] %vm313_vm6, %v468_v19  ;;  %v625_v22 = vadd.f32 %v624_v0, %v1375_v26 }
 0x1b1   : > { %484 = vst.msk [vmem:[%s1378_s26 + $0x32] sm:$0x1] %vm313_vm6, %v469_v20 }
 0x1b2   : > { %485 = vst.msk [vmem:[%s1378_s26 + $0x3a] sm:$0x1] %vm313_vm6, %v470_v21  ;;  %v628_v1 = vrot.slane %v625_v22, 1  ;;  %v629_v23 = vrot.slane %v625_v22, 2  ;;  %v630_v24 = vrot.slane %v625_v22, 3  ;;  %v631_v25 = vrot.slane %v625_v22, 4 }
 0x1b3   : > { %642 = vst.msk [vmem:[%s1378_s26 + $0x4] sm:$0x1] %vm313_vm6, %v625_v22  ;;  %v632_v27 = vrot.slane %v625_v22, 5  ;;  %v633_v28 = vrot.slane %v625_v22, 6  ;;  %v634_v29 = vrot.slane %v625_v22, 7 }
 0x1b4   : > { %643 = vst.msk [vmem:[%s1378_s26 + $0xc] sm:$0x1] %vm313_vm6, %v628_v1 }
 0x1b5   : > { %644 = vst.msk [vmem:[%s1378_s26 + $0x14] sm:$0x1] %vm313_vm6, %v629_v23 }
 0x1b6   : > { %645 = vst.msk [vmem:[%s1378_s26 + $0x1c] sm:$0x1] %vm313_vm6, %v630_v24 }
 0x1b7   : > { %646 = vst.msk [vmem:[%s1378_s26 + $0x24] sm:$0x1] %vm313_vm6, %v631_v25  ;;  %v788_v30 = vpop.f32.mrf.mxu3 }
 0x1b8   : > { %647 = vst.msk [vmem:[%s1378_s26 + $0x2c] sm:$0x1] %vm313_vm6, %v632_v27  ;;  %v789_v31 = vadd.f32 %v788_v30, %v1375_v26 }
 0x1b9   : > { %648 = vst.msk [vmem:[%s1378_s26 + $0x34] sm:$0x1] %vm313_vm6, %v633_v28 }
 0x1ba   : > { %649 = vst.msk [vmem:[%s1378_s26 + $0x3c] sm:$0x1] %vm313_vm6, %v634_v29  ;;  %v792_v32 = vrot.slane %v789_v31, 1  ;;  %v793_v33 = vrot.slane %v789_v31, 2  ;;  %v794_v34 = vrot.slane %v789_v31, 3  ;;  %v795_v35 = vrot.slane %v789_v31, 4 }
 0x1bb   : > { %806 = vst.msk [vmem:[%s1378_s26 + $0x6] sm:$0x1] %vm313_vm6, %v789_v31  ;;  %v796_v26 = vrot.slane %v789_v31, 5  ;;  %v797_v36 = vrot.slane %v789_v31, 6  ;;  %v798_v37 = vrot.slane %v789_v31, 7 }
 0x1bc   : > { %807 = vst.msk [vmem:[%s1378_s26 + $0xe] sm:$0x1] %vm313_vm6, %v792_v32 }
 0x1bd   : > { %808 = vst.msk [vmem:[%s1378_s26 + $0x16] sm:$0x1] %vm313_vm6, %v793_v33 }
 0x1be   : > { %809 = vst.msk [vmem:[%s1378_s26 + $0x1e] sm:$0x1] %vm313_vm6, %v794_v34 }
 0x1bf   : > { %810 = vst.msk [vmem:[%s1378_s26 + $0x26] sm:$0x1] %vm313_vm6, %v795_v35 }
 0x1c0   : > { %811 = vst.msk [vmem:[%s1378_s26 + $0x2e] sm:$0x1] %vm313_vm6, %v796_v26 }
 0x1c1   : > { %812 = vst.msk [vmem:[%s1378_s26 + $0x36] sm:$0x1] %vm313_vm6, %v797_v36 }
 0x1c2   : > { %813 = vst.msk [vmem:[%s1378_s26 + $0x3e] sm:$0x1] %vm313_vm6, %v798_v37 }
 0x1c3   : > { %1116 = shalt.err (!%p1113_p5)
}
 0x1c4   : > { %s1170_s22 = smov 128   ;;  %s1171_s24 = smov 8  }
 0x1c5   : > { %1030 = dma.vmem_to_hbm [thread:$0]  (%p1237_p4), %s911_s18, 1024, %s913_s7, %s897_s8, %s1170_s22, %s1170_s22, %s1171_s24  }
 0x1c6 PF: > { %p1036_p6 = scmp.ge.s32.totalorder %s1167_s20, 2  ;;  %s927_s26 = sand.u32 1, %s1147_s15  }
 0x1c7   : > { %s928_s29 = scalar_lea.sflag [#allocation3], %s927_s26 }
 0x1c8   : > { %p1033_p7 = pnand %p1036_p6, %p1244_p8 }
 0x1ca   : > { %p1034_p9 = pneg %p1033_p7 }
 0x1cc   : > { %1142 = dma.done.wait (%p1034_p9), %s928_s29, 1024  }
 0x1cd   : > { %1144 = vsyncadd (%p1034_p9), %s928_s29, 4294966272  ;;  %s17_s20 = sadd.s32 1, %s1167_s20   ;;  %s1570_s15 = smov %s1151_s16 }
 0x1ce   : > { %p14_p10 = scmp.ge.s32.totalorder %s17_s20, 4   ;;  %s1571_s16 = smov %s1155_s17 }
 0x1cf   : > { %s1572_s17 = smov %s1250_s28  ;;  %s1573_s18 = smov %s1163_s19 }
 0x1d0   : > { %s1574_s19 = smov %s1576_s23  ;;  %16 = sbr.rel (!%p14_p10) target bundleno = 4 (0x4), region = 71 }
 0x1d5   :  { %934 = vsyncpa [#allocation3], 1 }
 0x1d6   :  { %936 = vsyncpa [#allocation3 + $0x1], 1 }

</bundles_post_ra>
